<compile_context>
chip_gen: v7x
topology: tpu7x:2x2x1
jax: 0.10.0
libtpu: 0.0.40
codegen_flags: <defaults>
</compile_context>

<pallas_src>
import functools

import jax
import jax.numpy as jnp
import numpy as np
from jax.experimental import pallas as pl
from jax.experimental.pallas import tpu as pltpu


def _segmenter_kernel(z_ref, w_ref, o_ref, *, a_real):
    # z_ref : (Bt, A_pad, D) f32   w_ref : (D, Pt) bf16   o_ref : (Bt, A_pad, Pt)
    bt, a, d = z_ref.shape
    pt = w_ref.shape[1]

    # Stack the Bt batches into the MXU M dimension -> one big matmul.
    # Reshape in f32 (layout-free when A_pad % 8 == 0), then cast to bf16.
    z2 = z_ref[...].reshape(bt * a, d).astype(jnp.bfloat16)      # (Bt*A, D)
    logits = jnp.dot(z2, w_ref[...],
                     preferred_element_type=jnp.float32)         # (Bt*A, Pt) f32
    logits = logits.reshape(bt, a, pt)                           # (Bt, A, Pt)

    # Mask padded slots (if any) so they do not pollute the softmax denominator.
    if a != a_real:
        slot = jax.lax.broadcasted_iota(jnp.int32, (bt, a, pt), 1)
        logits = jnp.where(slot < a_real, logits, -jnp.inf)

    # Softmax over the slot / affordance axis (torch dim=1), in f32.
    m = jnp.max(logits, axis=1, keepdims=True)                   # (Bt, 1, Pt)
    e = jnp.exp(logits - m)                                      # (Bt, A, Pt)
    # TODO(synk): on v7x (EUP-limited once HBM-bound) the exp could be done in
    # bf16 (logits - m <= 0) for ~2x transcendental throughput.
    s = jnp.sum(e, axis=1, keepdims=True)                        # (Bt, 1, Pt)
    o_ref[...] = (e * pl.reciprocal(s, approx=True)).astype(o_ref.dtype)


def _largest_divisor_leq(n, cap):
    cap = int(max(1, min(n, cap)))
    for d in range(cap, 0, -1):
        if n % d == 0:
            return d
    return 1


def segmenter_forward(z, w_t, bias=None, *, out_dtype=jnp.float32,
                      m_cap=512, p_tile_cap=2048):
    """Segmenter forward.

    z    : (B, A, D=128) f32
    w_t  : (D, P) f32   fc1 weight, already transposed (torch stores (P, D))
    bias : (P,) f32     accepted for API parity but unused -- a per-point
                        constant added across the softmax (slot) axis is
                        softmax-invariant, so the output is unchanged.
    out_dtype : set to jnp.bfloat16 if the consumer tolerates it (halves the
                dominant output HBM write traffic); default f32 matches torch.
    """
    del bias
    B, A, D = z.shape
    P = w_t.shape[1]

    # Pad the slot axis to the f32 sublane count (8) so the in-kernel reshape
    # is layout-free; padded slots are masked to -inf inside the kernel.
    A_pad = 8 * (-(-A // 8))
    zp = z if A_pad == A else jnp.pad(z, ((0, 0), (0, A_pad - A), (0, 0)))

    # Batch tile: largest divisor of B with Bt*A_pad <= m_cap (MXU M up to
    # ~512 rows, no batch padding / no pre-kernel copy of z).
    Bt = _largest_divisor_leq(B, max(1, m_cap // A_pad))

    # Lane-dense P tile: divisor of round_up(P, 128), capped at p_tile_cap,
    # so at most 127 padded columns are ever written and stores are full vst.
    P128 = 128 * (-(-P // 128))
    Pt = 128 * _largest_divisor_leq(P128 // 128, p_tile_cap // 128)
    P_pad = P128
    wp = w_t if P_pad == P else jnp.pad(w_t, ((0, 0), (0, P_pad - P)))
    wp = wp.astype(jnp.bfloat16)     # bf16 MXU operand; halves weight DMA

    n_p, n_r = P_pad // Pt, B // Bt
    kernel = functools.partial(_segmenter_kernel, a_real=A)

    out = pl.pallas_call(
        kernel,
        out_shape=jax.ShapeDtypeStruct((B, A_pad, P_pad), out_dtype),
        # P outer / B inner: the weight block index is constant across the
        # inner axis, so the (D, Pt) slab stays resident instead of being
        # re-DMA'd per batch-row step.  When n_r == 1 the full z block is the
        # resident operand instead.  Leading (P) axis parallel -> balanced
        # megacore split on v7x even when B is small.
        grid=(n_p, n_r),
        in_specs=[
            pl.BlockSpec((Bt, A_pad, D), lambda p, r: (r, 0, 0)),
            pl.BlockSpec((D, Pt), lambda p, r: (0, p)),
        ],
        out_specs=pl.BlockSpec((Bt, A_pad, Pt), lambda p, r: (r, 0, p)),
        compiler_params=pltpu.CompilerParams(
            dimension_semantics=("parallel", "parallel"),
            vmem_limit_bytes=48 * 1024 * 1024),
    )(zp, wp)

    if A_pad != A or P_pad != P:
        out = out[:, :A, :P]
    return out


if __name__ == "__main__":
    # small shapes consistent with the module: num_affordances=8, num_points=128
    B, A, D, P = 2, 8, 128, 128

    key = jax.random.PRNGKey(0)
    kz, kw, kb = jax.random.split(key, 3)

    # PyTorch nn.Linear-style init: U(-1/sqrt(D), 1/sqrt(D)); weight is (out, in).
    bound = 1.0 / np.sqrt(D)
    w = jax.random.uniform(kw, (P, D), jnp.float32, -bound, bound)
    bias = jax.random.uniform(kb, (P,), jnp.float32, -bound, bound)
    z = jax.random.normal(kz, (B, A, D), jnp.float32)

    out = jax.block_until_ready(segmenter_forward(z, w.T, bias))

    # pure-JAX reference (with bias; identical after softmax over the slot axis).
    # Tolerance covers bf16 MXU operands + approx-reciprocal normalizer.
    ref = jax.nn.softmax(jnp.einsum("bad,pd->bap", z, w) + bias, axis=1)
    np.testing.assert_allclose(np.asarray(out), np.asarray(ref),
                               rtol=5e-3, atol=5e-3)

    # also exercise the padded-slot / padded-point path (A % 8 != 0, P % 128 != 0)
    A2, P2 = 6, 200
    kz2, kw2, kb2 = jax.random.split(jax.random.PRNGKey(0), 3)
    w2 = jax.random.uniform(kw2, (P2, D), jnp.float32, -bound, bound)
    b2 = jax.random.uniform(kb2, (P2,), jnp.float32, -bound, bound)
    z2 = jax.random.normal(kz2, (B, A2, D), jnp.float32)
    out2 = jax.block_until_ready(segmenter_forward(z2, w2.T, b2))
    ref2 = jax.nn.softmax(jnp.einsum("bad,pd->bap", z2, w2) + b2, axis=1)
    np.testing.assert_allclose(np.asarray(out2), np.asarray(ref2),
                               rtol=5e-3, atol=5e-3)

    print("KERNEL_OK")
</pallas_src>

<mosaic_0001>
module attributes {stable_mosaic.version = 11 : i64} {
  func.func @_segmenter_kernel(%arg0: i32, %arg1: i32, %arg2: memref<2x8x128xf32, #tpu.memory_space<vmem>>, %arg3: memref<128x128xbf16, #tpu.memory_space<vmem>>, %arg4: memref<2x8x128xf32, #tpu.memory_space<vmem>>) attributes {dimension_semantics = [#tpu.dimension_semantics<parallel>, #tpu.dimension_semantics<parallel>], iteration_bounds = array<i64: 1, 1>, scalar_prefetch = 0 : i64, scratch_operands = 0 : i64, tpu.core_type = #tpu.core_type<tc>, window_params = [{transform_indices = @transform_0, window_bounds = array<i64: 2, 8, 128>}, {transform_indices = @transform_1, window_bounds = array<i64: 128, 128>}, {transform_indices = @transform_2, window_bounds = array<i64: 2, 8, 128>}]} {
    %c0 = arith.constant 0 : index
    %c0_0 = arith.constant 0 : index
    %c0_1 = arith.constant 0 : index
    %0 = vector.load %arg2[%c0, %c0_0, %c0_1] : memref<2x8x128xf32, #tpu.memory_space<vmem>>, vector<2x8x128xf32>
    %1 = vector.shape_cast %0 : vector<2x8x128xf32> to vector<16x128xf32>
    %2 = arith.truncf %1 : vector<16x128xf32> to vector<16x128xbf16>
    %c0_2 = arith.constant 0 : index
    %c0_3 = arith.constant 0 : index
    %3 = vector.load %arg3[%c0_2, %c0_3] : memref<128x128xbf16, #tpu.memory_space<vmem>>, vector<128x128xbf16>
    %cst = arith.constant dense<0.000000e+00> : vector<16x128xf32>
    %4 = tpu.matmul %2, %3, %cst {dimension_numbers = #tpu.dot_dimension_numbers<[1], [0], [0], [1], [0, 0, 1, 1], [], []>} : vector<16x128xbf16>, vector<128x128xbf16>, vector<16x128xf32> -> vector<16x128xf32>
    %5 = vector.shape_cast %4 : vector<16x128xf32> to vector<2x8x128xf32>
    %cst_4 = arith.constant dense<0xFF800000> : vector<2x128xf32>
    %6 = vector.multi_reduction <maximumf>, %5, %cst_4 [1] : vector<2x8x128xf32> to vector<2x128xf32>
    %7 = vector.shape_cast %6 : vector<2x128xf32> to vector<2x1x128xf32>
    %8 = vector.broadcast %7 : vector<2x1x128xf32> to vector<2x8x128xf32>
    %9 = arith.subf %5, %8 : vector<2x8x128xf32>
    %10 = math.exp %9 : vector<2x8x128xf32>
    %cst_5 = arith.constant dense<0.000000e+00> : vector<2x128xf32>
    %11 = vector.multi_reduction <add>, %10, %cst_5 [1] : vector<2x8x128xf32> to vector<2x128xf32>
    %12 = vector.shape_cast %11 : vector<2x128xf32> to vector<2x1x128xf32>
    %13 = tpu.reciprocal %12 {approx = true} : vector<2x1x128xf32> -> vector<2x1x128xf32>
    %14 = vector.broadcast %13 : vector<2x1x128xf32> to vector<2x8x128xf32>
    %15 = arith.mulf %10, %14 : vector<2x8x128xf32>
    %c0_6 = arith.constant 0 : index
    %c0_7 = arith.constant 0 : index
    %c0_8 = arith.constant 0 : index
    %16 = vector.load %arg4[%c0_6, %c0_7, %c0_8] : memref<2x8x128xf32, #tpu.memory_space<vmem>>, vector<2x8x128xf32>
    tpu.vector_store %arg4[%c0_6, %c0_7, %c0_8], %15 {strides = array<i32>} : memref<2x8x128xf32, #tpu.memory_space<vmem>>, vector<2x8x128xf32>,
    return
  }
  func.func @transform_0(%arg0: i32, %arg1: i32) -> (i32, i32, i32) {
    %c0_i32 = arith.constant 0 : i32
    %c0_i32_0 = arith.constant 0 : i32
    %c0_i32_1 = arith.constant 0 : i32
    return %arg1, %c0_i32, %c0_i32_0 : i32, i32, i32
  }
  func.func @transform_1(%arg0: i32, %arg1: i32) -> (i32, i32) {
    %c0_i32 = arith.constant 0 : i32
    %c0_i32_0 = arith.constant 0 : i32
    return %c0_i32, %arg0 : i32, i32
  }
  func.func @transform_2(%arg0: i32, %arg1: i32) -> (i32, i32, i32) {
    %c0_i32 = arith.constant 0 : i32
    %c0_i32_0 = arith.constant 0 : i32
    return %arg1, %c0_i32, %arg0 : i32, i32, i32
  }
}

</mosaic_0001>

<bundles_post_ra>
// kernel: tpu_custom_call.1
= control target key start
LH: loop header
LB: loop body
LE: loop exit
PB: predicated region body
PF: predicated region fallthrough
CT: control target
= control target key end

     0   :  { %7 = vsyncpa [#allocation3], 0  ;;  %s403_s0 = inlined_call_operand.hbm [shape: f32[2,8,128], index: 0, kind: input, shape index: {}]   ;;  %s404_s1 = inlined_call_operand.hbm [shape: bf16[128,128], index: 1, kind: input, shape index: {}]   ;;  %s405_s2 = inlined_call_operand.hbm [shape: f32[2,8,128], index: 2, kind: output, shape index: {}]  }
   0x1   :  { %8 = vsyncpa [#allocation6], 0 }
   0x2   :  { %9 = vsyncpa [#allocation4], 0  ;;  %s337_s9 = smov [#allocation2]   ;;  %s265_s13 = scalar_lea.hbm %s403_s0, 256 }
   0x3   :  { %s15_s10 = sshll.u32 %s337_s9, 4  ;;  %p266_p0 = scmp.ne.s32.totalorder %s403_s0, %s265_s13  ;;  %s16_s10 = int_to_ptr.vmem [resolvable:$true] %s15_s10 }
   0x4   :  { %p269_p1 = scmp.lt.u32.totalorder %s265_s13, %s403_s0 }
   0x6   :  { %p271_p2 = pnand %p269_p1, %p266_p0 }
   0x8   :  { %274 = shalt.err (!%p271_p2)
}
   0x9   :  { %s275_s18 = scalar_lea.vmem %s16_s10, 256  ;;  %p280_p4 = scmp.lt.s32.totalorder %s16_s10, %s16_s10 }
   0xa   :  { %p276_p3 = scmp.ne.s32.totalorder %s16_s10, %s275_s18  ;;  %p281_p5 = scmp.lt.s32.totalorder %s275_s18, %s275_s18 }
   0xc   :  { %p282_p6 = por %p281_p5, %p280_p4 }
   0xe   :  { %p283_p7 = pnand %p282_p6, %p276_p3 }
  0x10   :  { %286 = shalt.err (!%p283_p7)
}
  0x11   :  { %s338_s19 = smov 128   ;;  %s339_s20 = smov 8  }
  0x12   :  { %21 = dma.hbm_to_vmem [thread:$0]  %s403_s0, 256, %s16_s10, [#allocation3], %s338_s19, %s338_s19, %s339_s20  }
  0x13   :  { %s340_s23 = smov [#allocation5]   ;;  %s287_s27 = scalar_lea.hbm %s404_s1, 1024 }
  0x14   :  { %s27_s24 = sshll.u32 %s340_s23, 4  ;;  %p288_p8 = scmp.ne.s32.totalorder %s404_s1, %s287_s27  ;;  %s28_s24 = int_to_ptr.vmem [resolvable:$true] %s27_s24 }
  0x15   :  { %p291_p9 = scmp.lt.u32.totalorder %s287_s27, %s404_s1 }
  0x17   :  { %p293_p10 = pnand %p291_p9, %p288_p8 }
  0x19   :  { %296 = shalt.err (!%p293_p10)
}
  0x1a   :  { %s297_s4 = scalar_lea.vmem %s28_s24, 1024  ;;  %p302_p12 = scmp.lt.s32.totalorder %s28_s24, %s28_s24 }
  0x1b   :  { %p298_p11 = scmp.ne.s32.totalorder %s28_s24, %s297_s4  ;;  %p303_p13 = scmp.lt.s32.totalorder %s297_s4, %s297_s4 }
  0x1d   :  { %p304_p0 = por %p303_p13, %p302_p12 }
  0x1f   :  { %p305_p1 = pnand %p304_p0, %p298_p11 }
  0x21   :  { %308 = shalt.err (!%p305_p1)
}
  0x22   :  { %s341_s0 = smov 64   ;;  %s342_s5 = smov 4  }
  0x23   :  { %33 = dma.hbm_to_vmem [thread:$0]  %s404_s1, 1024, %s28_s24, [#allocation6], %s341_s0, %s341_s0, %s342_s5  }
  0x24   :  { %331 = dma.done.wait [#allocation3], 256  }
  0x25   :  { %332 = vsyncadd [#allocation3], 4294967040 }
  0x26   :  { %333 = dma.done.wait [#allocation6], 1024  }
  0x27   :  { %334 = vsyncadd [#allocation6], 4294966272  ;;  %v343_v0 = vmov 0.0   ;;  %vm344_vm0 = vmmov 0   ;;  %v249_v1 = vld [vmem:[#allocation5] sm:$0xff]   ;;  %v250_v2 = vld [vmem:[#allocation5 + $0x8] sm:$0xff]  }
  0x28   :  { %220 = vmatprep.subr.bf16.mxu0 %v343_v0  ;;  %236 = vmatprep.mubr.msk.bf16.mxu0 %vm344_vm0, %v343_v0  ;;  %v251_v3 = vld [vmem:[#allocation5 + $0x10] sm:$0xff]   ;;  %v252_v4 = vld [vmem:[#allocation5 + $0x18] sm:$0xff]   ;;  %v253_v5 = vld [vmem:[#allocation5 + $0x20] sm:$0xff]   ;;  %s345_s1 = smov [#allocation7]  }
  0x29   :  { %221 = vmatpush3.bf16.msra.mxu0 %v249_v1  ;;  %v254_v6 = vld [vmem:[#allocation5 + $0x28] sm:$0xff]   ;;  %v255_v7 = vld [vmem:[#allocation5 + $0x30] sm:$0xff]   ;;  %v256_v8 = vld [vmem:[#allocation5 + $0x38] sm:$0xff]   ;;  %s190_s8 = sshll.u32 %s345_s1, 4  ;;  %s191_s8 = int_to_ptr.vmem [resolvable:$true] %s190_s8 }
  0x2a   :  { %222 = vmatprep.subr.bf16.mxu0 %v343_v0  ;;  %v41_v9 = vld [vmem:[#allocation2] sm:$0xff]  ;;  %v42_v10 = vld [vmem:[#allocation2 + $0x8] sm:$0xff]  ;;  %s309_s9 = scalar_lea.vmem %s191_s8, 256  ;;  %p314_p3 = scmp.lt.s32.totalorder %s191_s8, %s191_s8 }
  0x2b   :  { %v43_v11 = vpack.c.bf16 %v42_v10, %v41_v9  ;;  %p310_p2 = scmp.ne.s32.totalorder %s191_s8, %s309_s9  ;;  %p315_p4 = scmp.lt.s32.totalorder %s309_s9, %s309_s9 }
  0x2d   :  { %223 = vmatpush3.bf16.msra.mxu0 %v250_v2  ;;  %p316_p5 = por %p315_p4, %p314_p3 }
  0x2e   :  { %224 = vmatprep.subr.bf16.mxu0 %v343_v0 }
  0x2f   :  { %p317_p6 = pnand %p316_p5, %p310_p2 }
  0x31   :  { %225 = vmatpush3.bf16.msra.mxu0 %v251_v3 }
  0x32   :  { %226 = vmatprep.subr.bf16.mxu0 %v343_v0 }
  0x35   :  { %227 = vmatpush3.bf16.msra.mxu0 %v252_v4 }
  0x36   :  { %228 = vmatprep.subr.bf16.mxu0 %v343_v0 }
  0x39   :  { %229 = vmatpush3.bf16.msra.mxu0 %v253_v5 }
  0x3a   :  { %230 = vmatprep.subr.bf16.mxu0 %v343_v0 }
  0x3d   :  { %231 = vmatpush3.bf16.msra.mxu0 %v254_v6 }
  0x3e   :  { %232 = vmatprep.subr.bf16.mxu0 %v343_v0 }
  0x41   :  { %233 = vmatpush3.bf16.msra.mxu0 %v255_v7 }
  0x42   :  { %234 = vmatprep.subr.bf16.mxu0 %v343_v0 }
  0x45   :  { %235 = vmatpush3.bf16.msra.mxu0 %v256_v8 }
  0x48   :  { %237 = vmatmul.mubr.bf16.vlgmr.msra.gmra.mrb[0].mxu0 %v43_v11 }
 0x11b   :  { %v142_v12 = vpop.f32.mrb[0].mxu0 }
 0x11c   :  { %v149_v13 = vrot.slane %v142_v12, 4  ;;  %v238_v14 = vpop.f32.mrb[1].mxu0 }
 0x11d   :  { %v145_v15 = vpop.f32.mrb[2].mxu0 }
 0x11e   :  { %v150_v16 = vmax.f32 %v142_v12, %v149_v13  ;;  %v155_v17 = vrot.slane %v145_v15, 4  ;;  %v239_v18 = vpop.f32.mrb[3].mxu0 }
 0x120   :  { %v151_v19 = vrot.slane %v150_v16, 2  ;;  %v156_v20 = vmax.f32 %v145_v15, %v155_v17 }
 0x122   :  { %v152_v21 = vmax.f32 %v150_v16, %v151_v19  ;;  %v157_v22 = vrot.slane %v156_v20, 2 }
 0x124   :  { %v153_v23 = vrot.slane %v152_v21, 1  ;;  %v158_v24 = vmax.f32 %v156_v20, %v157_v22 }
 0x126   :  { %v154_v25 = vmax.f32 %v152_v21, %v153_v23  ;;  %v159_v26 = vrot.slane %v158_v24, 1 }
 0x128   :  { %v161_v27 = vsub.f32 %v142_v12, %v154_v25  ;;  %v160_v28 = vmax.f32 %v158_v24, %v159_v26 }
 0x12a   :  { %v163_v29 = vmul.f32 1.442695, %v161_v27  ;;  %v162_v30 = vsub.f32 %v145_v15, %v160_v28 }
 0x12c   :  { %257 = vpow2.f32 %v163_v29  ;;  %v165_v31 = vmul.f32 1.442695, %v162_v30 }
 0x12e   :  { %259 = vpow2.f32 %v165_v31 }
 0x136   :  { %v258_v32 = vpop.eup %257 }
 0x137   :  { %v167_v33 = vrot.slane %v258_v32, 4 }
 0x138   :  { %v260_v34 = vpop.eup %259 }
 0x139   :  { %v168_v35 = vadd.f32 %v258_v32, %v167_v33  ;;  %v173_v36 = vrot.slane %v260_v34, 4 }
 0x13b   :  { %v169_v37 = vrot.slane %v168_v35, 2  ;;  %v174_v38 = vadd.f32 %v260_v34, %v173_v36 }
 0x13d   :  { %v170_v39 = vadd.f32 %v169_v37, %v168_v35  ;;  %v175_v40 = vrot.slane %v174_v38, 2 }
 0x13f   :  { %v171_v41 = vrot.slane %v170_v39, 1  ;;  %v176_v42 = vadd.f32 %v175_v40, %v174_v38 }
 0x141   :  { %v172_v43 = vadd.f32 %v171_v41, %v170_v39  ;;  %v177_v44 = vrot.slane %v176_v42, 1 }
 0x143   :  { %v178_v45 = vadd.f32 %v177_v44, %v176_v42  ;;  %261 = vrcp.f32 %v172_v43 }
 0x145   :  { %263 = vrcp.f32 %v178_v45 }
 0x14d   :  { %v262_v46 = vpop.eup %261 }
 0x14e   :  { %v181_v47 = vmul.f32 %v262_v46, %v258_v32 }
 0x14f   :  { %v264_v48 = vpop.eup %263 }
 0x150   :  { %v182_v49 = vmul.f32 %v264_v48, %v260_v34  ;;  %183 = vst [vmem:[#allocation7] sm:$0xff] %v181_v47 }
 0x152   :  { %184 = vst [vmem:[#allocation7 + $0x8] sm:$0xff] %v182_v49 }
 0x153   :  { %320 = shalt.err (!%p317_p6)
}
 0x154   :  { %s321_s12 = scalar_lea.hbm %s405_s2, 256 }
 0x155   :  { %p322_p7 = scmp.ne.s32.totalorder %s405_s2, %s321_s12  ;;  %p325_p8 = scmp.lt.u32.totalorder %s321_s12, %s405_s2 }
 0x157   :  { %p327_p9 = pnand %p325_p8, %p322_p7 }
 0x159   :  { %330 = shalt.err (!%p327_p9)
}
 0x15a   :  { %196 = dma.vmem_to_hbm [thread:$0]  %s191_s8, 256, %s405_s2, [#allocation4], %s338_s19, %s338_s19, %s339_s20  }
 0x15b   :  { %335 = dma.done.wait [#allocation4], 256  }
 0x15c   :  { %336 = vsyncadd [#allocation4], 4294967040 }
 0x15d   :  { %200 = vsyncpa [#allocation3], 1 }
 0x15e   :  { %201 = vsyncpa [#allocation6], 1 }
 0x15f   :  { %202 = vsyncpa [#allocation4], 1 }

</bundles_post_ra>
